<compile_context>
chip_gen: v5e
topology: v5e:2x2
jax: 0.10.0
libtpu: 0.0.40
codegen_flags: <defaults>
</compile_context>

<pallas_src>
import jax
import jax.numpy as jnp
from jax.experimental import pallas as pl
from jax.experimental.pallas import tpu as pltpu


def td3_actor_kernel(x_ref, w1_ref, b1_ref, w2_ref, b2_ref, wa_ref, ba_ref, o_ref):
    # MLPBase hidden layer 1: Linear + ReLU (MXU matmul, f32 accumulate).
    h = jnp.dot(x_ref[...], w1_ref[...], preferred_element_type=jnp.float32)
    h = jnp.maximum(h + b1_ref[...], 0.0)
    # MLPBase hidden layer 2: Linear + ReLU.
    h = jnp.dot(h, w2_ref[...], preferred_element_type=jnp.float32)
    h = jnp.maximum(h + b2_ref[...], 0.0)
    # act_out head: Linear(hidden, act_dim) + tanh (tanh goes to the EUP slot).
    a = jnp.dot(h, wa_ref[...], preferred_element_type=jnp.float32) + ba_ref[...]
    o_ref[...] = jnp.tanh(a).astype(o_ref.dtype)


def td3_actor_forward(x, params, *, block_batch=512):
    """TD3Actor.forward hot path: MLP (Linear+ReLU x2) -> Linear -> tanh.

    Batch is gridded so the same kernel scales from tiny eval batches to
    RL-training batches (256-4096 rows); weights stay VMEM-resident.
    """
    w1, b1, w2, b2, wa, ba = params
    x = x.astype(jnp.float32)
    B, in_dim = x.shape
    act_dim = wa.shape[1]

    # Batch tile: whole batch when small (block == full array is always legal),
    # otherwise 8-sublane-aligned tiles with the batch padded to a multiple.
    if B <= block_batch:
        tb = B
        b_pad = B
    else:
        tb = block_batch  # multiple of 8
        b_pad = pl.cdiv(B, tb) * tb
    if b_pad != B:
        x = jnp.pad(x, ((0, b_pad - B), (0, 0)))

    resident = lambda i: (0, 0)  # weights/biases: same block every grid step

    out = pl.pallas_call(
        td3_actor_kernel,
        out_shape=jax.ShapeDtypeStruct((b_pad, act_dim), jnp.float32),
        grid=(b_pad // tb,),
        in_specs=[
            pl.BlockSpec((tb, in_dim), lambda i: (i, 0)),
            pl.BlockSpec(w1.shape, resident),
            pl.BlockSpec(b1.shape, resident),
            pl.BlockSpec(w2.shape, resident),
            pl.BlockSpec(b2.shape, resident),
            pl.BlockSpec(wa.shape, resident),
            pl.BlockSpec(ba.shape, resident),
        ],
        out_specs=pl.BlockSpec((tb, act_dim), lambda i: (i, 0)),
        compiler_params=pltpu.CompilerParams(
            # Batch rows are independent -> shard grid across v7x's 2 TCs.
            dimension_semantics=("parallel",),
        ),
    )(x, w1, b1, w2, b2, wa, ba)
    return out[:B]


def init_params(key, input_dim, hidden, act_dim):
    """Deterministic init mimicking PyTorch Linear default (+/- 1/sqrt(fan_in)).

    Weights returned already transposed to (in_features, out_features);
    biases as (1, out_features) to broadcast over batch rows.
    """
    ks = jax.random.split(key, 6)

    def lin(kw, kb, fan_in, fan_out):
        bound = 1.0 / jnp.sqrt(jnp.asarray(fan_in, jnp.float32))
        w = jax.random.uniform(kw, (fan_in, fan_out), jnp.float32, -bound, bound)
        b = jax.random.uniform(kb, (1, fan_out), jnp.float32, -bound, bound)
        return w, b

    w1, b1 = lin(ks[0], ks[1], input_dim, hidden)
    w2, b2 = lin(ks[2], ks[3], hidden, hidden)
    wa, ba = lin(ks[4], ks[5], hidden, act_dim)
    return (w1, b1, w2, b2, wa, ba)


def reference_actor(x, params):
    """Pure-JAX reference for correctness checking."""
    w1, b1, w2, b2, wa, ba = params
    x = x.astype(jnp.float32)
    h = jnp.maximum(x @ w1 + b1, 0.0)
    h = jnp.maximum(h @ w2 + b2, 0.0)
    return jnp.tanh(h @ wa + ba)


if __name__ == "__main__":
    # Small shapes consistent with the module:
    #   flattened obs dim = 12, act_hidden_size -> two hidden layers of 32,
    #   act_dim = 4 (continuous action), batch = 8.
    batch, obs_dim, hidden, act_dim = 8, 12, 32, 4

    key = jax.random.PRNGKey(0)
    k_obs, k_params = jax.random.split(key, 2)
    obs = jax.random.normal(k_obs, (batch, obs_dim), jnp.float32)
    params = init_params(k_params, obs_dim, hidden, act_dim)

    actions = td3_actor_forward(obs, params)
    actions = jax.block_until_ready(actions)

    ref = reference_actor(obs, params)
    assert actions.shape == (batch, act_dim)
    assert jnp.allclose(actions, ref, atol=1e-5, rtol=1e-5), "mismatch vs reference"
    assert bool(jnp.all(jnp.abs(actions) <= 1.0)), "tanh range violated"

    print("KERNEL_OK")
</pallas_src>

<mosaic_0001>
module attributes {stable_mosaic.version = 11 : i64} {
  func.func @td3_actor_kernel(%arg0: i32, %arg1: memref<8x12xf32, #tpu.memory_space<vmem>>, %arg2: memref<12x32xf32, #tpu.memory_space<vmem>>, %arg3: memref<1x32xf32, #tpu.memory_space<vmem>>, %arg4: memref<32x32xf32, #tpu.memory_space<vmem>>, %arg5: memref<1x32xf32, #tpu.memory_space<vmem>>, %arg6: memref<32x4xf32, #tpu.memory_space<vmem>>, %arg7: memref<1x4xf32, #tpu.memory_space<vmem>>, %arg8: memref<8x4xf32, #tpu.memory_space<vmem>>) attributes {dimension_semantics = [#tpu.dimension_semantics<parallel>], iteration_bounds = array<i64: 1>, scalar_prefetch = 0 : i64, scratch_operands = 0 : i64, tpu.core_type = #tpu.core_type<tc>, window_params = [{transform_indices = @transform_0, window_bounds = array<i64: 8, 12>}, {pipeline_mode = #tpu.pipeline_mode<synchronous>, transform_indices = @transform_1, window_bounds = array<i64: 12, 32>}, {pipeline_mode = #tpu.pipeline_mode<synchronous>, transform_indices = @transform_2, window_bounds = array<i64: 1, 32>}, {pipeline_mode = #tpu.pipeline_mode<synchronous>, transform_indices = @transform_3, window_bounds = array<i64: 32, 32>}, {pipeline_mode = #tpu.pipeline_mode<synchronous>, transform_indices = @transform_4, window_bounds = array<i64: 1, 32>}, {pipeline_mode = #tpu.pipeline_mode<synchronous>, transform_indices = @transform_5, window_bounds = array<i64: 32, 4>}, {pipeline_mode = #tpu.pipeline_mode<synchronous>, transform_indices = @transform_6, window_bounds = array<i64: 1, 4>}, {transform_indices = @transform_7, window_bounds = array<i64: 8, 4>}]} {
    %c0 = arith.constant 0 : index
    %c0_0 = arith.constant 0 : index
    %0 = vector.load %arg1[%c0, %c0_0] : memref<8x12xf32, #tpu.memory_space<vmem>>, vector<8x12xf32>
    %c0_1 = arith.constant 0 : index
    %c0_2 = arith.constant 0 : index
    %1 = vector.load %arg2[%c0_1, %c0_2] : memref<12x32xf32, #tpu.memory_space<vmem>>, vector<12x32xf32>
    %cst = arith.constant dense<0.000000e+00> : vector<8x32xf32>
    %2 = tpu.matmul %0, %1, %cst {dimension_numbers = #tpu.dot_dimension_numbers<[1], [0], [0], [1], [0, 0, 1, 1], [], []>} : vector<8x12xf32>, vector<12x32xf32>, vector<8x32xf32> -> vector<8x32xf32>
    %c0_3 = arith.constant 0 : index
    %c0_4 = arith.constant 0 : index
    %3 = vector.load %arg3[%c0_3, %c0_4] : memref<1x32xf32, #tpu.memory_space<vmem>>, vector<1x32xf32>
    %4 = vector.broadcast %3 : vector<1x32xf32> to vector<8x32xf32>
    %5 = arith.addf %2, %4 : vector<8x32xf32>
    %cst_5 = arith.constant 0.000000e+00 : f32
    %6 = vector.broadcast %cst_5 : f32 to vector<8x32xf32>
    %7 = arith.maximumf %5, %6 : vector<8x32xf32>
    %c0_6 = arith.constant 0 : index
    %c0_7 = arith.constant 0 : index
    %8 = vector.load %arg4[%c0_6, %c0_7] : memref<32x32xf32, #tpu.memory_space<vmem>>, vector<32x32xf32>
    %cst_8 = arith.constant dense<0.000000e+00> : vector<8x32xf32>
    %9 = tpu.matmul %7, %8, %cst_8 {dimension_numbers = #tpu.dot_dimension_numbers<[1], [0], [0], [1], [0, 0, 1, 1], [], []>} : vector<8x32xf32>, vector<32x32xf32>, vector<8x32xf32> -> vector<8x32xf32>
    %c0_9 = arith.constant 0 : index
    %c0_10 = arith.constant 0 : index
    %10 = vector.load %arg5[%c0_9, %c0_10] : memref<1x32xf32, #tpu.memory_space<vmem>>, vector<1x32xf32>
    %11 = vector.broadcast %10 : vector<1x32xf32> to vector<8x32xf32>
    %12 = arith.addf %9, %11 : vector<8x32xf32>
    %cst_11 = arith.constant 0.000000e+00 : f32
    %13 = vector.broadcast %cst_11 : f32 to vector<8x32xf32>
    %14 = arith.maximumf %12, %13 : vector<8x32xf32>
    %c0_12 = arith.constant 0 : index
    %c0_13 = arith.constant 0 : index
    %15 = vector.load %arg6[%c0_12, %c0_13] : memref<32x4xf32, #tpu.memory_space<vmem>>, vector<32x4xf32>
    %cst_14 = arith.constant dense<0.000000e+00> : vector<8x4xf32>
    %16 = tpu.matmul %14, %15, %cst_14 {dimension_numbers = #tpu.dot_dimension_numbers<[1], [0], [0], [1], [0, 0, 1, 1], [], []>} : vector<8x32xf32>, vector<32x4xf32>, vector<8x4xf32> -> vector<8x4xf32>
    %c0_15 = arith.constant 0 : index
    %c0_16 = arith.constant 0 : index
    %17 = vector.load %arg7[%c0_15, %c0_16] : memref<1x4xf32, #tpu.memory_space<vmem>>, vector<1x4xf32>
    %18 = vector.broadcast %17 : vector<1x4xf32> to vector<8x4xf32>
    %19 = arith.addf %16, %18 : vector<8x4xf32>
    %20 = math.tanh %19 : vector<8x4xf32>
    %c0_17 = arith.constant 0 : index
    %c0_18 = arith.constant 0 : index
    %21 = vector.load %arg8[%c0_17, %c0_18] : memref<8x4xf32, #tpu.memory_space<vmem>>, vector<8x4xf32>
    tpu.vector_store %arg8[%c0_17, %c0_18], %20 {strides = array<i32>} : memref<8x4xf32, #tpu.memory_space<vmem>>, vector<8x4xf32>,
    return
  }
  func.func @transform_0(%arg0: i32) -> (i32, i32) {
    %c0_i32 = arith.constant 0 : i32
    %c0_i32_0 = arith.constant 0 : i32
    return %arg0, %c0_i32 : i32, i32
  }
  func.func @transform_1(%arg0: i32) -> (i32, i32) {
    %c0_i32 = arith.constant 0 : i32
    %c0_i32_0 = arith.constant 0 : i32
    %c0_i32_1 = arith.constant 0 : i32
    return %c0_i32, %c0_i32_0 : i32, i32
  }
  func.func @transform_2(%arg0: i32) -> (i32, i32) {
    %c0_i32 = arith.constant 0 : i32
    %c0_i32_0 = arith.constant 0 : i32
    %c0_i32_1 = arith.constant 0 : i32
    return %c0_i32, %c0_i32_0 : i32, i32
  }
  func.func @transform_3(%arg0: i32) -> (i32, i32) {
    %c0_i32 = arith.constant 0 : i32
    %c0_i32_0 = arith.constant 0 : i32
    %c0_i32_1 = arith.constant 0 : i32
    return %c0_i32, %c0_i32_0 : i32, i32
  }
  func.func @transform_4(%arg0: i32) -> (i32, i32) {
    %c0_i32 = arith.constant 0 : i32
    %c0_i32_0 = arith.constant 0 : i32
    %c0_i32_1 = arith.constant 0 : i32
    return %c0_i32, %c0_i32_0 : i32, i32
  }
  func.func @transform_5(%arg0: i32) -> (i32, i32) {
    %c0_i32 = arith.constant 0 : i32
    %c0_i32_0 = arith.constant 0 : i32
    %c0_i32_1 = arith.constant 0 : i32
    return %c0_i32, %c0_i32_0 : i32, i32
  }
  func.func @transform_6(%arg0: i32) -> (i32, i32) {
    %c0_i32 = arith.constant 0 : i32
    %c0_i32_0 = arith.constant 0 : i32
    %c0_i32_1 = arith.constant 0 : i32
    return %c0_i32, %c0_i32_0 : i32, i32
  }
  func.func @transform_7(%arg0: i32) -> (i32, i32) {
    %c0_i32 = arith.constant 0 : i32
    %c0_i32_0 = arith.constant 0 : i32
    return %arg0, %c0_i32 : i32, i32
  }
}

</mosaic_0001>

<bundles_post_ra>
// kernel: tpu_custom_call.1
= control target key start
LH: loop header
LB: loop body
LE: loop exit
PB: predicated region body
PF: predicated region fallthrough
CT: control target
= control target key end

     0   :  { %12 = vsyncpa [#allocation3], 0  ;;  %s316_s0 = inlined_call_operand.hbm [shape: f32[8,12], index: 0, kind: input, shape index: {}]   ;;  %s317_s1 = inlined_call_operand.hbm [shape: f32[12,32], index: 1, kind: input, shape index: {}]   ;;  %s318_s2 = inlined_call_operand.vmem [shape: f32[1,32], index: 2, kind: input, shape index: {}]   ;;  %s319_s3 = inlined_call_operand.vmem [shape: f32[32,32], index: 3, kind: input, shape index: {}]   ;;  %s320_s4 = inlined_call_operand.vmem [shape: f32[1,32], index: 4, kind: input, shape index: {}]   ;;  %s321_s5 = inlined_call_operand.vmem [shape: f32[32,4], index: 5, kind: input, shape index: {}]   ;;  %s322_s6 = inlined_call_operand.vmem [shape: f32[1,4], index: 6, kind: input, shape index: {}]   ;;  %s323_s7 = inlined_call_operand.vmem [shape: f32[8,4], index: 7, kind: output, shape index: {}]  }
   0x1   :  { %s19_s26 = sshll.u32 %s316_s0, 4  ;;  %s20_s26 = int_to_ptr.hbm [resolvable:$true] %s19_s26 }
   0x2   :  { %13 = vsyncpa [#allocation5], 0  ;;  %s230_s27 = smov [#allocation2]   ;;  %s29_s8 = sshll.u32 %s317_s1, 4  ;;  %s30_s8 = int_to_ptr.hbm [resolvable:$true] %s29_s8 }
   0x3   :  { %s21_s28 = sshll.u32 %s230_s27, 4  ;;  %s231_s9 = smov [#allocation4]   ;;  %s22_s28 = int_to_ptr.vmem [resolvable:$true] %s21_s28 }
   0x4   :  { %24 = dma.hbm_to_vmem [thread:$0]  %s20_s26, 128, %s22_s28, [#allocation3]  }
   0x5   :  { %s31_s10 = sshll.u32 %s231_s9, 4  ;;  %s232_s11 = smov 128   ;;  %s32_s10 = int_to_ptr.vmem [resolvable:$true] %s31_s10 }
   0x6   :  { %s233_s12 = smov 8  }
   0x7   :  { %37 = dma.hbm_to_vmem [thread:$0]  %s30_s8, 256, %s32_s10, [#allocation5], %s232_s11, %s232_s11, %s233_s12  }
   0x8   :  { %226 = dma.done.wait [#allocation3], 128  }
   0x9   :  { %227 = vsyncadd [#allocation3], 4294967168 }
   0xa   :  { %228 = dma.done.wait [#allocation5], 256  }
   0xb   :  { %229 = vsyncadd [#allocation5], 4294967040  ;;  %vm67_vm0 = vcmask 1043456   ;;  %v58_v0 = vld [vmem:[#allocation4 + $0x8] sm:$0xf]  ;;  %v57_v1 = vld [vmem:[#allocation4] sm:$0xff] }
   0xc   :  { %165 = vmatpush.msk.msra.mxu0 %vm67_vm0, %v58_v0  ;;  %v56_v2 = vld [vmem:[#allocation2] sm:$0xff]  ;;  %vm63_vm1 = vcmask 97280   ;;  %v95_v3 = vld [vmem:[%s319_s3 + $0x18] sm:$0xff]  ;;  %v94_v4 = vld [vmem:[%s319_s3 + $0x10] sm:$0xff]  ;;  %vm100_vm2 = vcmask 261120   ;;  %vm157_vm3 = vcmask 31744  }
   0xd   :  { %116 = vmatpush.msra.mxu1 %v95_v3  ;;  %v93_v5 = vld [vmem:[%s319_s3 + $0x8] sm:$0xff]  ;;  %v92_v6 = vld [vmem:[%s319_s3] sm:$0xff]  ;;  %v128_v7 = vld [vmem:[%s321_s5 + $0x18] sm:$0xff] }
   0xe   :  { %86 = vmatpush.msra.mxu0 %v57_v1  ;;  %148 = vmatpush.msra.mxu2 %v128_v7  ;;  %v173_v8 = vld [vmem:[%s318_s2] ss:$0 sm:$0xff]  ;;  %v127_v12 = vld [vmem:[%s321_s5 + $0x10] sm:$0xff]  ;;  %v126_v13 = vld [vmem:[%s321_s5 + $0x8] sm:$0xff] }
   0xf   :  { %166 = vmatmul.msk.f32.vlgmr.msra.gmra.mxu0 %vm63_vm1, %v56_v2  ;;  %117 = vmatpush.msra.mxu1 %v94_v4  ;;  %v125_v14 = vld [vmem:[%s321_s5] sm:$0xff] }
  0x10   :  { %149 = vmatpush.msra.mxu2 %v127_v12  ;;  %v174_v15 = vld [vmem:[%s320_s4] ss:$0 sm:$0xff] }
  0x11   :  { %118 = vmatpush.msra.mxu1 %v93_v5  ;;  %v175_v19 = vld [vmem:[%s322_s6] ss:$0 sm:$0xff] }
  0x12   :  { %150 = vmatpush.msra.mxu2 %v126_v13 }
  0x13   :  { %119 = vmatpush.msra.mxu1 %v92_v6 }
  0x14   :  { %151 = vmatpush.msra.mxu2 %v125_v14 }
  0x8c   :  { %v88_v9 = vpop.f32.mrf.mxu0 }
  0x8d   :  { %v89_v10 = vadd.f32 %v173_v8, %v88_v9 }
  0x8f   :  { %v91_v11 = vmax.f32 %v89_v10, 0.0 }
  0x91   :  { %167 = vmatmul.msk.f32.vlgmr.msra.gmra.mxu1 %vm100_vm2, %v91_v11 }
 0x10e   :  { %v121_v16 = vpop.f32.mrf.mxu1 }
 0x10f   :  { %v122_v17 = vadd.f32 %v174_v15, %v121_v16 }
 0x111   :  { %v124_v18 = vmax.f32 %v122_v17, 0.0 }
 0x113   :  { %168 = vmatmul.msk.f32.vlgmr.msra.gmra.mxu2 %vm100_vm2, %v124_v18 }
 0x196   :  { %v153_v20 = vpop.f32.mrf.mxu2 }
 0x197   :  { %v154_v21 = vadd.f32 %v175_v19, %v153_v20 }
 0x199   :  { %176 = vtanh.f32 %v154_v21 }
 0x19f   :  { %v177_v22 = vpop.eup %176 }
 0x1a0   :  { %158 = vst.msk [vmem:[%s323_s7] sm:$0xff] %vm157_vm3, %v177_v22 }
 0x1a1   :  { %163 = vsyncpa [#allocation3], 1 }
 0x1a2   :  { %164 = vsyncpa [#allocation5], 1 }

</bundles_post_ra>
